<compile_context>
chip_gen: v6e
topology: v6e:2x2x1
jax: 0.10.0
libtpu: 0.0.40
codegen_flags: <defaults>
</compile_context>

<pallas_src>
import functools
from math import sqrt

import jax
import jax.numpy as jnp
from jax import lax
from jax.experimental import pallas as pl
from jax.experimental.pallas import tpu as pltpu

# ----------------------- small, deterministic hparams -----------------------
LANGUAGES   = 2      # hparams.languages_number  (= conv groups)
SYM_EMB     = 8      # hparams.symbols_embedding_dim
GEN_DIM     = 16     # hparams.generator_dim
BOTTLENECK  = 4      # hparams.bottleneck_dim

KERNEL_SIZE = 3
STRIDE      = 1
PADDING     = 1
DILATION    = 1

C_IN      = SYM_EMB * LANGUAGES          # 16
C_OUT     = SYM_EMB * LANGUAGES          # 16
IN_PER_G  = C_IN // LANGUAGES            # 8
OUT_PER_G = C_OUT // LANGUAGES           # 8
KERNEL_OUT_SIZE = OUT_PER_G * IN_PER_G * KERNEL_SIZE   # 192

LANE       = 128
MAX_TILE_L = 32768   # lane tile: amortizes ~0.35us/step; dbl-buffered in+out is
                     # ~8 MiB f32 / ~4 MiB bf16 -> safe on v7x's 64 MiB VMEM.

# TODO(synk): only the odd-K "same" configuration (K=3, stride=1, dilation=1,
# padding=(K-1)//2) of this layer is implemented in the fast path.
assert STRIDE == 1 and DILATION == 1 and KERNEL_SIZE == 3 and PADDING == (KERNEL_SIZE - 1) // 2


def _round_up(x, m):
    return ((x + m - 1) // m) * m


# ----------------------- weight generation (plain XLA, tiny) -----------------
def prepare_params(params):
    """Pre-transpose the generator Linears once, outside the forward."""
    return dict(
        wb_t=params["wb"].T, bb=params["bb"],
        wk_t=params["wk"].T, bk=params["bk"],
        wbias_t=params["wbias"].T, bbias=params["bbias"],
    )


def _generate_conv_weights(prepared, language_embedding):
    h = language_embedding @ prepared["wb_t"] + prepared["bb"]          # [G, bottleneck]
    kflat = h @ prepared["wk_t"] + prepared["bk"]                       # [G, out/g*in/g*K]
    bflat = h @ prepared["wbias_t"] + prepared["bbias"]                 # [G, out/g]
    conv_w = kflat.reshape(C_OUT, IN_PER_G, KERNEL_SIZE)                # PyTorch .view
    conv_b = bflat.reshape(C_OUT, 1)
    # Fold the grouped weight into K block-diagonal [C_OUT, C_IN] matrices (one per
    # tap) so the conv kernel is K accumulated MXU dots with no staging scratch.
    w_g = conv_w.reshape(LANGUAGES, OUT_PER_G, IN_PER_G, KERNEL_SIZE)
    eye = jnp.eye(LANGUAGES, dtype=conv_w.dtype)
    w_taps = jnp.einsum("goik,gh->kgohi", w_g, eye).reshape(KERNEL_SIZE, C_OUT, C_IN)
    return w_taps, conv_b


# ----------------------- grouped conv1d Pallas kernel -------------------------
def _conv_kernel(x_ref, xl_ref, xr_ref, w_ref, b_ref, o_ref, *, seq_len, tile_l):
    # x_ref : (1, C_IN, tile_l)   current L tile (input dtype)
    # xl_ref: (1, C_IN, 128)      128-block just left of the tile (halo source)
    # xr_ref: (1, C_IN, 128)      128-block just right of the tile (halo source)
    # w_ref : (K, C_OUT, C_IN)    per-tap block-diagonal weights (VMEM-resident)
    # b_ref : (C_OUT, 1)          f32 bias
    # o_ref : (1, C_OUT, tile_l)
    i = pl.program_id(1)

    x_c = x_ref[0]                                             # (C_IN, tile_l)
    lane = lax.broadcasted_iota(jnp.int32, (1, tile_l), 1)
    zero_col = jnp.zeros((C_IN, 1), x_c.dtype)

    # Zero columns beyond the sequence end (select, NOT multiply — edge-block padding
    # is undefined/NaN).  Neutralizes a ragged last block and doubles as the conv's
    # right zero-padding inside the tile.
    if seq_len % tile_l != 0:
        cols = lane + i * tile_l
        x_c = jnp.where(cols < seq_len, x_c, jnp.zeros((), x_c.dtype))

    # Halo columns (global columns i*tile_l - 1 and (i+1)*tile_l), selected to zero at
    # the global boundaries so they implement the conv's zero padding.
    left_col = jnp.where(i > 0, xl_ref[0, :, LANE - 1:LANE], zero_col)           # (C_IN,1)
    right_col = jnp.where((i + 1) * tile_l < seq_len, xr_ref[0, :, 0:1], zero_col)

    # Shifted slabs for taps k=0 and k=2 (XLU roll + boundary-column injection).
    slab_l = jnp.where(lane == 0, left_col, pltpu.roll(x_c, 1, 1))                # x[l-1]
    slab_r = jnp.where(lane == tile_l - 1, right_col,
                       pltpu.roll(x_c, tile_l - 1, 1))                            # x[l+1]

    # Three accumulated MXU contractions, all operands held in vregs (no staging).
    acc = jnp.dot(w_ref[0], slab_l, preferred_element_type=jnp.float32)
    acc += jnp.dot(w_ref[1], x_c, preferred_element_type=jnp.float32)
    acc += jnp.dot(w_ref[2], slab_r, preferred_element_type=jnp.float32)
    o_ref[0] = (acc + b_ref[...]).astype(o_ref.dtype)


def grouped_conv1d(x, w_taps, conv_b, *, max_tile_l=MAX_TILE_L):
    n, c_in, length = x.shape
    assert c_in == C_IN
    l_out = length                                     # "same" conv (S=1, P=(K-1)//2)

    tile_l = min(max_tile_l, _round_up(length, LANE))  # lane-dense tile, >=128
    # v7x has 2 TensorCores sharded over 'parallel' grid axes: keep >=4 grid steps
    # when possible so neither core idles on short-sequence / small-batch calls.
    while n * pl.cdiv(length, tile_l) < 4 and tile_l > LANE:
        tile_l = _round_up(tile_l // 2, LANE)

    bpt = tile_l // LANE                               # 128-blocks per tile
    n_lane_blocks = pl.cdiv(length, LANE)
    grid = (n, pl.cdiv(l_out, tile_l))

    # TODO(synk): for tiny L (e.g. the L=16 driver case) per-step + dispatch overhead
    # dominates; folding several batch elements per grid step would recover most of it.

    compute_dtype = x.dtype
    w_taps = w_taps.astype(compute_dtype)              # bf16 MXU operands when x is bf16
    conv_b = conv_b.astype(jnp.float32)                # bias added on the f32 accumulator

    kernel = functools.partial(_conv_kernel, seq_len=length, tile_l=tile_l)

    itemsize = jnp.dtype(compute_dtype).itemsize
    flops = 2 * n * l_out * C_OUT * C_IN * KERNEL_SIZE      # block-diag MXU work
    bytes_accessed = (itemsize * n * length * (C_IN + C_OUT)
                      + itemsize * n * grid[1] * 2 * C_IN * LANE    # halo re-reads
                      + int(w_taps.size) * itemsize + int(conv_b.size) * 4)

    return pl.pallas_call(
        kernel,
        out_shape=jax.ShapeDtypeStruct((n, C_OUT, l_out), compute_dtype),
        grid_spec=pltpu.PrefetchScalarGridSpec(
            num_scalar_prefetch=0,
            grid=grid,
            in_specs=[
                # main L tile (no pre-padding of the array)
                pl.BlockSpec((1, C_IN, tile_l), lambda b, i: (b, 0, i)),
                # left-neighbour 128-block (provides column i*tile_l - 1)
                pl.BlockSpec((1, C_IN, LANE),
                             lambda b, i: (b, 0, jnp.maximum(i * bpt - 1, 0))),
                # right-neighbour 128-block (provides column (i+1)*tile_l)
                pl.BlockSpec((1, C_IN, LANE),
                             lambda b, i: (b, 0, jnp.minimum((i + 1) * bpt,
                                                             n_lane_blocks - 1))),
                # per-tap weights + bias: constant index_map -> DMA'd once, VMEM-resident
                pl.BlockSpec((KERNEL_SIZE, C_OUT, C_IN), lambda b, i: (0, 0, 0)),
                pl.BlockSpec((C_OUT, 1), lambda b, i: (0, 0)),
            ],
            out_specs=pl.BlockSpec((1, C_OUT, tile_l), lambda b, i: (b, 0, i)),
        ),
        compiler_params=pltpu.CompilerParams(
            dimension_semantics=("parallel", "parallel"),
            vmem_limit_bytes=32 * 1024 * 1024),
        cost_estimate=pl.CostEstimate(flops=flops, transcendentals=0,
                                      bytes_accessed=bytes_accessed),
    )(x, x, x, w_taps, conv_b)


# ----------------------- module forward --------------------------------------
@functools.partial(jax.jit, static_argnames=("max_tile_l",))
def conv1d_generated_forward(prepared_params, language_embedding, inputs,
                             max_tile_l=MAX_TILE_L):
    assert language_embedding.shape[0] == LANGUAGES
    w_taps, conv_b = _generate_conv_weights(prepared_params, language_embedding)
    output = grouped_conv1d(inputs, w_taps, conv_b, max_tile_l=max_tile_l)
    return language_embedding, output


# ----------------------- deterministic param init ----------------------------
def init_params(key):
    def linear(key, fan_in, fan_out):
        k1, k2 = jax.random.split(key)
        bound = 1.0 / sqrt(fan_in)
        w = jax.random.uniform(k1, (fan_out, fan_in), jnp.float32, -bound, bound)
        b = jax.random.uniform(k2, (fan_out,), jnp.float32, -bound, bound)
        return w, b

    k1, k2, k3 = jax.random.split(key, 3)
    wb, bb = linear(k1, GEN_DIM, BOTTLENECK)                 # _bottleneck
    wk, bk = linear(k2, BOTTLENECK, KERNEL_OUT_SIZE)         # _kernel
    wbias, bbias = linear(k3, BOTTLENECK, OUT_PER_G)         # _bias
    return dict(wb=wb, bb=bb, wk=wk, bk=bk, wbias=wbias, bbias=bbias)


# ----------------------- pure-JAX reference -----------------------------------
def reference_forward(params, language_embedding, inputs):
    h = language_embedding @ params["wb"].T + params["bb"]
    kflat = h @ params["wk"].T + params["bk"]
    bflat = h @ params["wbias"].T + params["bbias"]
    conv_w = kflat.reshape(C_OUT, IN_PER_G, KERNEL_SIZE)
    conv_b = bflat.reshape(C_OUT)
    out = jax.lax.conv_general_dilated(
        inputs, conv_w,
        window_strides=(STRIDE,), padding=[(PADDING, PADDING)],
        rhs_dilation=(DILATION,),
        dimension_numbers=("NCH", "OIH", "NCH"),
        feature_group_count=LANGUAGES)
    return out + conv_b.reshape(1, C_OUT, 1)


# ----------------------- main -------------------------------------------------
if __name__ == "__main__":
    key = jax.random.PRNGKey(0)
    kp, k1, k2 = jax.random.split(key, 3)

    params = init_params(kp)
    prepared = prepare_params(params)
    language_embedding = jax.random.normal(k1, (LANGUAGES, GEN_DIM), jnp.float32)

    # -- primary small-shape check (f32, single ragged 128-lane tile) ------------
    inputs = jax.random.normal(k2, (2, C_IN, 16), jnp.float32)   # [N, C_in, L] (NCL)
    lang_out, out = conv1d_generated_forward(prepared, language_embedding, inputs)
    out = jax.block_until_ready(out)
    ref = reference_forward(params, language_embedding, inputs)
    assert out.shape == ref.shape, (out.shape, ref.shape)
    assert jnp.allclose(out, ref, rtol=1e-4, atol=1e-4), float(jnp.max(jnp.abs(out - ref)))

    # -- multi-tile halo / ragged-tail / exact-multiple coverage (f32) -----------
    for n_b, length in ((1, 300), (2, 256)):
        kx = jax.random.fold_in(k2, length)
        x = jax.random.normal(kx, (n_b, C_IN, length), jnp.float32)
        _, o = conv1d_generated_forward(prepared, language_embedding, x, max_tile_l=128)
        o = jax.block_until_ready(o)
        r = reference_forward(params, language_embedding, x)
        assert o.shape == r.shape, (o.shape, r.shape)
        assert jnp.allclose(o, r, rtol=1e-4, atol=1e-4), float(jnp.max(jnp.abs(o - r)))

    # -- bf16 HBM path (perf configuration; loose tolerance vs f32 reference) ----
    x_bf16 = inputs.astype(jnp.bfloat16)
    _, o_bf16 = conv1d_generated_forward(prepared, language_embedding, x_bf16)
    o_bf16 = jax.block_until_ready(o_bf16).astype(jnp.float32)
    assert bool(jnp.all(jnp.isfinite(o_bf16)))
    assert jnp.allclose(o_bf16, ref, rtol=7e-2, atol=7e-2), \
        float(jnp.max(jnp.abs(o_bf16 - ref)))

    print("KERNEL_OK")
</pallas_src>

<mosaic_0001>
module attributes {stable_mosaic.version = 11 : i64} {
  func.func @_conv_kernel(%arg0: i32, %arg1: i32, %arg2: memref<1x16x128xf32, #tpu.memory_space<vmem>>, %arg3: memref<1x16x128xf32, #tpu.memory_space<vmem>>, %arg4: memref<1x16x128xf32, #tpu.memory_space<vmem>>, %arg5: memref<3x16x16xf32, #tpu.memory_space<vmem>>, %arg6: memref<16x1xf32, #tpu.memory_space<vmem>>, %arg7: memref<1x16x128xf32, #tpu.memory_space<vmem>>) attributes {dimension_semantics = [#tpu.dimension_semantics<parallel>, #tpu.dimension_semantics<parallel>], iteration_bounds = array<i64: 2, 1>, scalar_prefetch = 0 : i64, scratch_operands = 0 : i64, tpu.core_type = #tpu.core_type<tc>, window_params = [{transform_indices = @transform_0, window_bounds = array<i64: 1, 16, 128>}, {transform_indices = @transform_1, window_bounds = array<i64: 1, 16, 128>}, {transform_indices = @transform_2, window_bounds = array<i64: 1, 16, 128>}, {pipeline_mode = #tpu.pipeline_mode<synchronous>, transform_indices = @transform_3, window_bounds = array<i64: 3, 16, 16>}, {pipeline_mode = #tpu.pipeline_mode<synchronous>, transform_indices = @transform_4, window_bounds = array<i64: 16, 1>}, {transform_indices = @transform_5, window_bounds = array<i64: 1, 16, 128>}]} {
    %c0 = arith.constant 0 : index
    %c0_0 = arith.constant 0 : index
    %c0_1 = arith.constant 0 : index
    %0 = vector.load %arg2[%c0, %c0_0, %c0_1] : memref<1x16x128xf32, #tpu.memory_space<vmem>>, vector<1x16x128xf32>
    %1 = vector.shape_cast %0 : vector<1x16x128xf32> to vector<16x128xf32>
    %2 = tpu.iota {dimensions = array<i32: 1>} : vector<1x128xi32>
    %cst = arith.constant 0.000000e+00 : f32
    %3 = vector.broadcast %cst : f32 to vector<16x1xf32>
    %c128_i32 = arith.constant 128 : i32
    %4 = arith.muli %arg1, %c128_i32 : i32
    %5 = vector.broadcast %4 : i32 to vector<1x128xi32>
    %6 = arith.addi %2, %5 : vector<1x128xi32>
    %c16_i32 = arith.constant 16 : i32
    %7 = vector.broadcast %c16_i32 : i32 to vector<1x128xi32>
    %8 = arith.cmpi slt, %6, %7 : vector<1x128xi32>
    %cst_2 = arith.constant 0.000000e+00 : f32
    %9 = vector.shape_cast %8 : vector<1x128xi1> to vector<1x128xi1>
    %10 = vector.broadcast %9 : vector<1x128xi1> to vector<16x128xi1>
    %11 = vector.broadcast %cst_2 : f32 to vector<16x128xf32>
    %12 = arith.select %10, %1, %11 : vector<16x128xi1>, vector<16x128xf32>
    %c0_i32 = arith.constant 0 : i32
    %13 = arith.cmpi sgt, %arg1, %c0_i32 : i32
    %c0_3 = arith.constant 0 : index
    %c0_4 = arith.constant 0 : index
    %c127 = arith.constant 127 : index
    %14 = vector.load %arg3[%c0_3, %c0_4, %c127] : memref<1x16x128xf32, #tpu.memory_space<vmem>>, vector<1x16x1xf32>
    %15 = vector.shape_cast %14 : vector<1x16x1xf32> to vector<16x1xf32>
    %16 = arith.select %13, %15, %3 : vector<16x1xf32>
    %c1_i32 = arith.constant 1 : i32
    %17 = arith.addi %arg1, %c1_i32 : i32
    %c128_i32_5 = arith.constant 128 : i32
    %18 = arith.muli %17, %c128_i32_5 : i32
    %c16_i32_6 = arith.constant 16 : i32
    %19 = arith.cmpi slt, %18, %c16_i32_6 : i32
    %c0_7 = arith.constant 0 : index
    %c0_8 = arith.constant 0 : index
    %c0_9 = arith.constant 0 : index
    %20 = vector.load %arg4[%c0_7, %c0_8, %c0_9] : memref<1x16x128xf32, #tpu.memory_space<vmem>>, vector<1x16x1xf32>
    %21 = vector.shape_cast %20 : vector<1x16x1xf32> to vector<16x1xf32>
    %22 = arith.select %19, %21, %3 : vector<16x1xf32>
    %c0_i32_10 = arith.constant 0 : i32
    %23 = vector.broadcast %c0_i32_10 : i32 to vector<1x128xi32>
    %24 = arith.cmpi eq, %2, %23 : vector<1x128xi32>
    %c1_i32_11 = arith.constant 1 : i32
    %25 = tpu.dynamic_rotate %12 by %c1_i32_11 dim 1 : vector<16x128xf32>, i32 -> vector<16x128xf32>
    %26 = vector.shape_cast %24 : vector<1x128xi1> to vector<1x128xi1>
    %27 = vector.broadcast %26 : vector<1x128xi1> to vector<16x128xi1>
    %28 = vector.shape_cast %16 : vector<16x1xf32> to vector<16x1xf32>
    %29 = vector.broadcast %28 : vector<16x1xf32> to vector<16x128xf32>
    %30 = arith.select %27, %29, %25 : vector<16x128xi1>, vector<16x128xf32>
    %c127_i32 = arith.constant 127 : i32
    %31 = vector.broadcast %c127_i32 : i32 to vector<1x128xi32>
    %32 = arith.cmpi eq, %2, %31 : vector<1x128xi32>
    %c127_i32_12 = arith.constant 127 : i32
    %33 = tpu.dynamic_rotate %12 by %c127_i32_12 dim 1 : vector<16x128xf32>, i32 -> vector<16x128xf32>
    %34 = vector.shape_cast %32 : vector<1x128xi1> to vector<1x128xi1>
    %35 = vector.broadcast %34 : vector<1x128xi1> to vector<16x128xi1>
    %36 = vector.shape_cast %22 : vector<16x1xf32> to vector<16x1xf32>
    %37 = vector.broadcast %36 : vector<16x1xf32> to vector<16x128xf32>
    %38 = arith.select %35, %37, %33 : vector<16x128xi1>, vector<16x128xf32>
    %c0_13 = arith.constant 0 : index
    %c0_14 = arith.constant 0 : index
    %c0_15 = arith.constant 0 : index
    %39 = vector.load %arg5[%c0_13, %c0_14, %c0_15] : memref<3x16x16xf32, #tpu.memory_space<vmem>>, vector<1x16x16xf32>
    %40 = vector.shape_cast %39 : vector<1x16x16xf32> to vector<16x16xf32>
    %cst_16 = arith.constant dense<0.000000e+00> : vector<16x128xf32>
    %41 = tpu.matmul %40, %30, %cst_16 {dimension_numbers = #tpu.dot_dimension_numbers<[1], [0], [0], [1], [0, 0, 1, 1], [], []>} : vector<16x16xf32>, vector<16x128xf32>, vector<16x128xf32> -> vector<16x128xf32>
    %c1 = arith.constant 1 : index
    %c0_17 = arith.constant 0 : index
    %c0_18 = arith.constant 0 : index
    %42 = vector.load %arg5[%c1, %c0_17, %c0_18] : memref<3x16x16xf32, #tpu.memory_space<vmem>>, vector<1x16x16xf32>
    %43 = vector.shape_cast %42 : vector<1x16x16xf32> to vector<16x16xf32>
    %cst_19 = arith.constant dense<0.000000e+00> : vector<16x128xf32>
    %44 = tpu.matmul %43, %12, %cst_19 {dimension_numbers = #tpu.dot_dimension_numbers<[1], [0], [0], [1], [0, 0, 1, 1], [], []>} : vector<16x16xf32>, vector<16x128xf32>, vector<16x128xf32> -> vector<16x128xf32>
    %45 = arith.addf %41, %44 : vector<16x128xf32>
    %c2 = arith.constant 2 : index
    %c0_20 = arith.constant 0 : index
    %c0_21 = arith.constant 0 : index
    %46 = vector.load %arg5[%c2, %c0_20, %c0_21] : memref<3x16x16xf32, #tpu.memory_space<vmem>>, vector<1x16x16xf32>
    %47 = vector.shape_cast %46 : vector<1x16x16xf32> to vector<16x16xf32>
    %cst_22 = arith.constant dense<0.000000e+00> : vector<16x128xf32>
    %48 = tpu.matmul %47, %38, %cst_22 {dimension_numbers = #tpu.dot_dimension_numbers<[1], [0], [0], [1], [0, 0, 1, 1], [], []>} : vector<16x16xf32>, vector<16x128xf32>, vector<16x128xf32> -> vector<16x128xf32>
    %49 = arith.addf %45, %48 : vector<16x128xf32>
    %c0_23 = arith.constant 0 : index
    %c0_24 = arith.constant 0 : index
    %50 = vector.load %arg6[%c0_23, %c0_24] : memref<16x1xf32, #tpu.memory_space<vmem>>, vector<16x1xf32>
    %51 = vector.broadcast %50 : vector<16x1xf32> to vector<16x128xf32>
    %52 = arith.addf %49, %51 : vector<16x128xf32>
    %c0_25 = arith.constant 0 : index
    %c0_26 = arith.constant 0 : index
    %c0_27 = arith.constant 0 : index
    %53 = vector.load %arg7[%c0_25, %c0_26, %c0_27] : memref<1x16x128xf32, #tpu.memory_space<vmem>>, vector<1x16x128xf32>
    %54 = vector.shape_cast %53 : vector<1x16x128xf32> to vector<16x128xf32>
    %55 = vector.shape_cast %52 : vector<16x128xf32> to vector<1x16x128xf32>
    tpu.vector_store %arg7[%c0_25, %c0_26, %c0_27], %55 {strides = array<i32>} : memref<1x16x128xf32, #tpu.memory_space<vmem>>, vector<1x16x128xf32>,
    return
  }
  func.func @transform_0(%arg0: i32, %arg1: i32) -> (i32, i32, i32) {
    %c0_i32 = arith.constant 0 : i32
    %c0_i32_0 = arith.constant 0 : i32
    return %arg0, %c0_i32, %arg1 : i32, i32, i32
  }
  func.func @transform_1(%arg0: i32, %arg1: i32) -> (i32, i32, i32) {
    %c1_i32 = arith.constant 1 : i32
    %0 = arith.muli %arg1, %c1_i32 : i32
    %c1_i32_0 = arith.constant 1 : i32
    %1 = arith.subi %0, %c1_i32_0 : i32
    %c0_i32 = arith.constant 0 : i32
    %2 = arith.maxsi %1, %c0_i32 : i32
    %c0_i32_1 = arith.constant 0 : i32
    %c0_i32_2 = arith.constant 0 : i32
    return %arg0, %c0_i32_1, %2 : i32, i32, i32
  }
  func.func @transform_2(%arg0: i32, %arg1: i32) -> (i32, i32, i32) {
    %c1_i32 = arith.constant 1 : i32
    %0 = arith.addi %arg1, %c1_i32 : i32
    %c1_i32_0 = arith.constant 1 : i32
    %1 = arith.muli %0, %c1_i32_0 : i32
    %c0_i32 = arith.constant 0 : i32
    %2 = arith.minsi %1, %c0_i32 : i32
    %c0_i32_1 = arith.constant 0 : i32
    %c0_i32_2 = arith.constant 0 : i32
    return %arg0, %c0_i32_1, %2 : i32, i32, i32
  }
  func.func @transform_3(%arg0: i32, %arg1: i32) -> (i32, i32, i32) {
    %c0_i32 = arith.constant 0 : i32
    %c0_i32_0 = arith.constant 0 : i32
    %c0_i32_1 = arith.constant 0 : i32
    %c0_i32_2 = arith.constant 0 : i32
    return %c0_i32, %c0_i32_0, %c0_i32_1 : i32, i32, i32
  }
  func.func @transform_4(%arg0: i32, %arg1: i32) -> (i32, i32) {
    %c0_i32 = arith.constant 0 : i32
    %c0_i32_0 = arith.constant 0 : i32
    %c0_i32_1 = arith.constant 0 : i32
    return %c0_i32, %c0_i32_0 : i32, i32
  }
  func.func @transform_5(%arg0: i32, %arg1: i32) -> (i32, i32, i32) {
    %c0_i32 = arith.constant 0 : i32
    %c0_i32_0 = arith.constant 0 : i32
    return %arg0, %c0_i32, %arg1 : i32, i32, i32
  }
}

</mosaic_0001>

<bundles_post_ra>
// kernel: conv1d_generated_forward.1
= control target key start
LH: loop header
LB: loop body
LE: loop exit
PB: predicated region body
PF: predicated region fallthrough
CT: control target
= control target key end

     0   :  { %10 = vsyncpa [#allocation3], 0  ;;  %s1226_s0 = inlined_call_operand.vmem [shape: f32[2,16,16], index: 0, kind: input, shape index: {}, may-alias: {0,1,2}]   ;;  %s1227_s1 = inlined_call_operand.vmem [shape: f32[2,16,16], index: 1, kind: input, shape index: {}, may-alias: {0,1,2}]   ;;  %s1228_s2 = inlined_call_operand.vmem [shape: f32[2,16,16], index: 2, kind: input, shape index: {}, may-alias: {0,1,2}]   ;;  %s1229_s3 = inlined_call_operand.vmem [shape: f32[3,16,16], index: 3, kind: input, shape index: {}]   ;;  %s1230_s4 = inlined_call_operand.vmem [shape: f32[16,1], index: 4, kind: input, shape index: {}]   ;;  %s1231_s5 = inlined_call_operand.hbm [shape: f32[2,16,16], index: 5, kind: output, shape index: {}]  }
   0x1   :  { %12 = vsyncpa [#allocation3 + $0x1], 0  ;;  %s1076_s18 = smov 0   ;;  %s1078_s19 = smov 0  }
   0x2   :  { %s1080_s20 = smov 0   ;;  %s1082_s1 = smov 0  }
   0x3   :  { %s1084_s2 = smov 0   ;;  %s1086_s21 = smov 0  }
   0x4 LB: > { %s819_s22 = sadd.s32 4294967295, %s1036_s21   ;;  %s820_s23 = sadd.s32 4294967294, %s1036_s21   ;;  %s1036_s21 = sphi %s1086_s21, %s18_s21   ;;  %s1032_s2 = sphi %s1084_s2, %s1238_s2   ;;  %s1028_s1 = sphi %s1082_s1, %s1237_s1   ;;  %s1024_s20 = sphi %s1080_s20, %s1236_s20   ;;  %s1020_s19 = sphi %s1078_s19, %s1235_s19   ;;  %s1016_s18 = sphi %s1076_s18, %s1234_s18  }
   0x5   : > { %s30_s24 = sadd.s32 1, %s1032_s2  ;;  %s177_s25 = sadd.s32 1, %s1024_s20 }
   0x6   : > { %p32_p0 = scmp.ge.s32.totalorder %s30_s24, 2  ;;  %p187_p1 = scmp.ne.s32.totalorder %s1024_s20, %s1020_s19 }
   0x7   : > { %p188_p2 = scmp.eq.s32.totalorder %s819_s22, 1  ;;  %p193_p3 = scmp.ne.s32.totalorder %s1020_s19, %s1016_s18 }
   0x8   : > { %s1240_s24 = smov (%p32_p0, %s30_s24), 0  ;;  %p194_p5 = scmp.eq.s32.totalorder %s820_s23, 1 }
   0x9   : > { %p1116_p4 = por %p188_p2, %p187_p1  ;;  %s172_s27 = ssub.s32 %s1032_s2, %s1240_s24 }
   0xa   : > { %p823_p6 = scmp.ge.s32.totalorder %s1036_s21, 1  ;;  %p175_p7 = scmp.eq.s32.totalorder %s172_s27, 0 }
   0xb   : > { %p1123_p8 = por %p194_p5, %p193_p3  ;;  %p263_p9 = scmp.lt.s32.totalorder %s1036_s21, 3 }
   0xc   : > { %s1129_s29 = scalar_select %p175_p7, %s1024_s20, %s177_s25  }
   0xd   : > { %p264_p10 = pnand %p823_p6, %p263_p9 }
   0xe   : > { %p316_p11 = scmp.lt.s32.totalorder (!%p264_p10), %s1028_s1, 1  ;;  %s1041_s14 = smov (!%p264_p10), 1  }
   0xf   : > { %267 = sbr.rel (%p264_p10) target bundleno = 371 (0x173), region = 40  ;;  %s1042_s23 = smov (!%p264_p10), 127  }
  0x10   : > { %s313_s11 = sand.u32 (!%p264_p10), 1, %s1020_s19   ;;  %s851_s15 = sshll.u32 (!%p264_p10), %s1028_s1, 8 }
  0x11   : > { %s824_s12 = sshll.u32 (!%p264_p10), %s313_s11, 4  ;;  %s1179_s22 = scalar_lea.hbm (!%p264_p10), %s1231_s5, %s851_s15 }
  0x12   : > { %s1043_s25 = smov (!%p264_p10), [#allocation2]  }
  0x13   : > { %s964_s27 = sshll.u32 (!%p264_p10), %s1043_s25, 4  ;;  %s965_s27 = int_to_ptr.vmem [resolvable:$false] %s964_s27 }
  0x14   : > { %v354_v0 = vlaneseq  ;;  %v1038_v1 = vmov 127   ;;  %v1039_v2 = vmov 0   ;;  %s317_s30 = scalar_select %p316_p11, %s1028_s1, 1  ;;  %v1040_v4 = vmov 0.0   ;;  %v831_v5 = vld [vmem:[%s1229_s3 + $0x10] sm:$0xff]  ;;  %v420_v6 = vld [vmem:[%s1229_s3] sm:$0xff] }
  0x15   : > { %947 = vset.pattern.permute.xlu0 %v1038_v1  ;;  %959 = vset.pattern.permute.xlu1 %v1039_v2  ;;  %vm425_vm0 = vcmask 130048   ;;  %v832_v11 = vld [vmem:[%s1229_s3 + $0x18] sm:$0xff]  ;;  %v839_v12 = vld [vmem:[%s1229_s3 + $0x20] sm:$0xff]  ;;  %v675_v13 = vld [vmem:[%s1230_s4 + $0x8] sm:$0xff] }
  0x16   : > { %v355_v3 = vand.u32 127, %v354_v0  ;;  %949 = vperm.xlu0 %947, %v1040_v4   ;;  %s848_s8 = sshll.u32 %s317_s30, 4  ;;  %868 = vmatprep.mubr.msk.f32.mxu0 %vm425_vm0, %v831_v5  ;;  %v674_v14 = vld [vmem:[%s1230_s4] sm:$0xff]  ;;  %v421_v24 = vld [vmem:[%s1229_s3 + $0x8] sm:$0xff]  ;;  %s966_s30 = scalar_lea.vmem %s965_s27, 512 }
  0x17   : > { %s323_s13 = scalar_lea.vmem %s1226_s0, %s848_s8  ;;  %875 = vmatprep.mubr.msk.f32.mxu1 %vm425_vm0, %v420_v6  ;;  %v840_v30 = vld [vmem:[%s1229_s3 + $0x28] sm:$0xff] }
  0x18   : > { %vm359_vm1 = vcmp.lt.s32.totalorder %v355_v3, 16  ;;  %v353_v7 = vld [vmem:[%s323_s13 + $0x8] sm:$0xff]  ;;  %v352_v8 = vld [vmem:[%s323_s13] sm:$0xff]  ;;  %vm382_vm2 = vcmp.eq.s32.totalorder %v355_v3, 0  ;;  %vm401_vm3 = vcmp.eq.s32.totalorder %v355_v3, 127  ;;  %s315_s13 = scalar_lea.vmem [#allocation2], %s824_s12 }
  0x19   : > { %v363_v9 = vsel %vm359_vm1, %v353_v7, 0.0  ;;  %864 = vmatprep.subr.msk.mxu0 %vm359_vm1, %v353_v7  ;;  %v362_v10 = vsel %vm359_vm1, %v352_v8, 0.0 }
  0x1a   : > { %953 = vset.pattern.permute.xlu0 %v1039_v2  ;;  %385 = vrot.lane.b32.xlu1 %v363_v9, %s1041_s14 }
  0x1b   : > { %955 = vperm.xlu0 %953, %v1040_v4   ;;  %865 = vmatpush3.msk.msra.mxu0 %vm359_vm1, %v353_v7 }
  0x1c   : > { %866 = vmatprep.subr.msk.mxu0 %vm359_vm1, %v352_v8 }
  0x1d   : > { %867 = vmatpush3.msk.msra.mxu0 %vm359_vm1, %v352_v8 }
  0x1e   : > { %383 = vrot.lane.b32.xlu1 %v362_v10, %s1041_s14  ;;  %869 = vmatmul.mubr.msk.f32.vlgmr.msra.gmra.mxu0 %vm425_vm0, %v832_v11  ;;  %s705_s14 = sshll.u32 %s315_s13, 4  ;;  %s1174_s14 = int_to_ptr.vmem [resolvable:$true] %s705_s14 }
  0x1f   : > { %402 = vrot.lane.b32.xlu0 %v362_v10, %s1042_s23  ;;  %882 = vmatprep.mubr.msk.f32.mxu0 %vm425_vm0, %v839_v12  ;;  %s960_s1 = scalar_lea.vmem %s1174_s14, 256  ;;  %p967_p1 = scmp.lt.s32.totalorder %s1174_s14, %s965_s27 }
  0x20   : > { %p961_p12 = scmp.ne.s32.totalorder %s1174_s14, %s960_s1  ;;  %p968_p2 = scmp.lt.s32.totalorder %s966_s30, %s960_s1 }
  0x22   : > { %404 = vrot.lane.b32.xlu1 %v363_v9, %s1042_s23  ;;  %s1181_s23 = scalar_lea.sflag [#allocation3], %s313_s11  ;;  %p962_p13 = pnand %p961_p12, %p1116_p4 }
  0x23   : > { %683 = vperm.xlu0 %953, %v675_v13   ;;  %p969_p3 = por %p968_p2, %p967_p1 }
  0x24   : > { %p963_p0 = pneg %p962_p13 }
  0x26   : > { %678 = vperm.xlu1 %959, %v674_v14   ;;  %p970_p5 = pnand %p969_p3, %p963_p0 }
  0x8c   : > { %v386_v15 = vpop.permute.xlu1 %385 }
  0x90   : > { %v384_v17 = vpop.permute.xlu1 %383 }
  0x91   : > { %v950_v16 = vpop.permute.xlu0 %949 }
  0x92   : > { %v952_v18 = vunpack.i.h.bf16 %v950_v16  ;;  %v951_v19 = vunpack.i.l.bf16 %v950_v16 }
  0x94   : > { %v400_v20 = vsel %vm382_vm2, %v951_v19, %v386_v15  ;;  %v399_v22 = vsel %vm382_vm2, %v952_v18, %v384_v17  ;;  %v405_v23 = vpop.permute.xlu1 %404 }
  0x95   : > { %871 = vmatprep.subr.mxu1 %v400_v20 }
  0x96   : > { %v956_v21 = vpop.permute.xlu0 %955  ;;  %872 = vmatpush3.msra.mxu1 %v400_v20 }
  0x97   : > { %v957_v25 = vunpack.i.l.bf16 %v956_v21  ;;  %873 = vmatprep.subr.mxu1 %v399_v22  ;;  %v958_v26 = vunpack.i.h.bf16 %v956_v21 }
  0x98   : > { %874 = vmatpush3.msra.mxu1 %v399_v22 }
  0x99   : > { %876 = vmatmul.mubr.msk.f32.vlgmr.msra.gmra.mxu1 %vm425_vm0, %v421_v24  ;;  %v419_v27 = vsel %vm401_vm3, %v957_v25, %v405_v23 }
  0x9a   : > { %v403_v28 = vpop.permute.xlu0 %402  ;;  %878 = vmatprep.subr.mxu0 %v419_v27 }
  0x9b   : > { %879 = vmatpush3.msra.mxu0 %v419_v27  ;;  %v418_v29 = vsel %vm401_vm3, %v958_v26, %v403_v28 }
  0x9c   : > { %880 = vmatprep.subr.mxu0 %v418_v29 }
  0x9d   : > { %881 = vmatpush3.msra.mxu0 %v418_v29 }
  0x9e   : > { %883 = vmatmul.mubr.msk.f32.vlgmr.msra.gmra.mxu0 %vm425_vm0, %v840_v30  ;;  %v684_v37 = vpop.permute.xlu0 %683 }
  0xa1   : > { %v679_v41 = vpop.permute.xlu1 %678 }
  0xde   : > { %v870_v31 = vpop.f32.mrf.mxu0 }
  0xe0   : > { %v498_v33 = vpop.f32.mrf.mxu0 }
 0x159   : > { %v877_v32 = vpop.f32.mrf.mxu1 }
 0x15a   : > { %v585_v35 = vadd.f32 %v877_v32, %v870_v31 }
 0x15b   : > { %v579_v34 = vpop.f32.mrf.mxu1 }
 0x15c   : > { %v580_v38 = vadd.f32 %v579_v34, %v498_v33 }
 0x15e   : > { %v884_v36 = vpop.f32.mrf.mxu0 }
 0x15f   : > { %v673_v39 = vadd.f32 %v884_v36, %v585_v35 }
 0x160   : > { %v663_v40 = vpop.f32.mrf.mxu0 }
 0x161   : > { %v687_v42 = vadd.f32 %v684_v37, %v673_v39  ;;  %v672_v43 = vadd.f32 %v663_v40, %v580_v38 }
 0x163   : > { %689 = vst [vmem:[%s315_s13 + $0x8] sm:$0xff] %v687_v42  ;;  %v686_v44 = vadd.f32 %v679_v41, %v672_v43 }
 0x165   : > { %688 = vst [vmem:[%s315_s13] sm:$0xff] %v686_v44 }
 0x166   : > { %973 = shalt.err (!%p970_p5)
}
 0x167   : > { %s974_s6 = scalar_lea.hbm %s1179_s22, 256  ;;  %s978_s9 = scalar_lea.hbm %s1231_s5, 512 }
 0x168   : > { %p975_p6 = scmp.ne.s32.totalorder %s1179_s22, %s974_s6  ;;  %p979_p10 = scmp.lt.s32.totalorder %s1179_s22, %s1231_s5 }
 0x169   : > { %p980_p11 = scmp.lt.s32.totalorder %s978_s9, %s974_s6 }
 0x16a   : > { %p976_p7 = pnand %p975_p6, %p1116_p4 }
 0x16b   : > { %p981_p12 = por %p980_p11, %p979_p10 }
 0x16c   : > { %p977_p9 = pneg %p976_p7 }
 0x16e   : > { %p982_p13 = pnand %p981_p12, %p977_p9 }
 0x170   : > { %985 = shalt.err (!%p982_p13)
}
 0x171   : > { %s1044_s12 = smov 128   ;;  %s1045_s13 = smov 8  }
 0x172   : > { %885 = dma.vmem_to_hbm [thread:$0]  (%p1116_p4), %s1174_s14, 256, %s1179_s22, %s1181_s23, %s1044_s12, %s1044_s12, %s1045_s13  }
 0x173 PF: > { %p891_p0 = scmp.ge.s32.totalorder %s1036_s21, 2  ;;  %s720_s15 = sand.u32 1, %s1016_s18  }
 0x174   : > { %s721_s16 = scalar_lea.sflag [#allocation3], %s720_s15 }
 0x175   : > { %p888_p1 = pnand %p891_p0, %p1123_p8 }
 0x177   : > { %p889_p2 = pneg %p888_p1 }
 0x179   : > { %1011 = dma.done.wait (%p889_p2), %s721_s16, 256  }
 0x17a   : > { %1013 = vsyncadd (%p889_p2), %s721_s16, 4294967040  ;;  %s18_s21 = sadd.s32 1, %s1036_s21   ;;  %s1234_s18 = smov %s1020_s19 }
 0x17b   : > { %p15_p3 = scmp.ge.s32.totalorder %s18_s21, 4   ;;  %s1235_s19 = smov %s1024_s20 }
 0x17c   : > { %s1236_s20 = smov %s1129_s29  ;;  %s1237_s1 = smov %s1032_s2 }
 0x17d   : > { %s1238_s2 = smov %s1240_s24  ;;  %17 = sbr.rel (!%p15_p3) target bundleno = 4 (0x4), region = 83 }
 0x182   :  { %726 = vsyncpa [#allocation3], 1 }
 0x183   :  { %728 = vsyncpa [#allocation3 + $0x1], 1 }

</bundles_post_ra>
